<compile_context>
chip_gen: v7x
topology: tpu7x:2x2x1
jax: 0.10.0
libtpu: 0.0.40
codegen_flags: <defaults>
</compile_context>

<pallas_src>
import jax
import jax.numpy as jnp
from jax.experimental import pallas as pl
from jax.experimental.pallas import tpu as pltpu

IN_FEATURES = 64 * 2 * 2   # 256
HIDDEN = 100
OUT_FEATURES = 10

TILE_B_MAX = 8192          # ~8 us of x DMA per grid step vs ~0.35 us step overhead


def _round_up(n, m):
    return ((n + m - 1) // m) * m


def _mlp_kernel(x_ref, w1_ref, b1_ref, w2_ref, b2_ref, o_ref):
    # fc1 + tanh: (tile_b, 256) f32 @ (256, 100) f32 on the MXU (f32 accumulate),
    # bias add on the VPU, tanh on the EUP — all hidden under the x DMA.
    h = jnp.tanh(
        jnp.dot(x_ref[...], w1_ref[...], preferred_element_type=jnp.float32)
        + b1_ref[...])
    # fc2: (tile_b, 100) @ (100, 10). Narrow store: the HBM writeback is only
    # 40 B/row (the in-kernel masked vst is not the bottleneck; DMA bytes are).
    o_ref[...] = (
        jnp.dot(h, w2_ref[...], preferred_element_type=jnp.float32)
        + b2_ref[...])


def full_connected_layer(x, w1, b1, w2, b2):
    """x: (B, 256) f32; w1: (256, 100); b1: (1, 100); w2: (100, 10); b2: (1, 10).

    Weights are stored pre-transposed as (in_features, out_features).
    Returns (B, 10) f32.
    """
    B = x.shape[0]

    # Batch tiling with bounded padding: <8 junk rows per tile, never up to a
    # whole tile (fixes the B=1032 -> b_pad=2048 pathology).
    n_tiles = pl.cdiv(B, TILE_B_MAX)
    tile_b = _round_up(pl.cdiv(B, n_tiles), 8)
    b_pad = n_tiles * tile_b

    # Only touch x if row padding is actually needed (no cast, no lane pad).
    x_in = x if b_pad == B else jnp.pad(x, ((0, b_pad - B), (0, 0)))

    cost = pl.CostEstimate(
        flops=2 * b_pad * (IN_FEATURES * HIDDEN + HIDDEN * OUT_FEATURES),
        transcendentals=b_pad * HIDDEN,
        bytes_accessed=(x_in.size * 4 + w1.size * 4 + b1.size * 4
                        + w2.size * 4 + b2.size * 4
                        + b_pad * OUT_FEATURES * 4),
    )

    out = pl.pallas_call(
        _mlp_kernel,
        out_shape=jax.ShapeDtypeStruct((b_pad, OUT_FEATURES), jnp.float32),
        grid=(n_tiles,),
        in_specs=[
            # x: pipelined (double-buffered) over the batch grid.
            pl.BlockSpec((tile_b, IN_FEATURES), lambda i: (i, 0)),
            # weights/biases: constant index_map -> fetched once, VMEM-resident.
            pl.BlockSpec((IN_FEATURES, HIDDEN), lambda i: (0, 0)),
            pl.BlockSpec((1, HIDDEN), lambda i: (0, 0)),
            pl.BlockSpec((HIDDEN, OUT_FEATURES), lambda i: (0, 0)),
            pl.BlockSpec((1, OUT_FEATURES), lambda i: (0, 0)),
        ],
        out_specs=pl.BlockSpec((tile_b, OUT_FEATURES), lambda i: (i, 0)),
        compiler_params=pltpu.CompilerParams(
            dimension_semantics=("parallel",),
            vmem_limit_bytes=32 * 1024 * 1024),
        cost_estimate=cost,
    )(x_in, w1, b1, w2, b2)

    return out if b_pad == B else out[:B]


def init_params(key):
    """PyTorch nn.Linear default init: U(-1/sqrt(fan_in), 1/sqrt(fan_in))."""
    k1, k2, k3, k4 = jax.random.split(key, 4)
    bound1 = 1.0 / (IN_FEATURES ** 0.5)
    bound2 = 1.0 / (HIDDEN ** 0.5)
    # Stored as (in, out) — i.e. the transpose of PyTorch's (out, in) weight.
    w1 = jax.random.uniform(k1, (IN_FEATURES, HIDDEN), jnp.float32, -bound1, bound1)
    b1 = jax.random.uniform(k2, (1, HIDDEN), jnp.float32, -bound1, bound1)
    w2 = jax.random.uniform(k3, (HIDDEN, OUT_FEATURES), jnp.float32, -bound2, bound2)
    b2 = jax.random.uniform(k4, (1, OUT_FEATURES), jnp.float32, -bound2, bound2)
    return w1, b1, w2, b2


def reference(x, w1, b1, w2, b2):
    h = jnp.tanh(x @ w1 + b1)
    return h @ w2 + b2


if __name__ == "__main__":
    key = jax.random.PRNGKey(0)
    kx, kp = jax.random.split(key)

    B = 8
    x = jax.random.normal(kx, (B, IN_FEATURES), jnp.float32)
    w1, b1, w2, b2 = init_params(kp)

    out = full_connected_layer(x, w1, b1, w2, b2)
    out = jax.block_until_ready(out)

    ref = reference(x, w1, b1, w2, b2)
    assert out.shape == (B, OUT_FEATURES)
    # Kernel math is f32-in / f32-accumulate; the tolerance only needs to cover
    # XLA's default (bf16-pass) matmul precision used by the jnp reference.
    assert jnp.allclose(out, ref, atol=1e-2, rtol=1e-2), \
        f"max abs err {jnp.max(jnp.abs(out - ref))}"

    print("KERNEL_OK")
</pallas_src>

<mosaic_0001>
module attributes {stable_mosaic.version = 11 : i64} {
  func.func @_mlp_kernel(%arg0: i32, %arg1: memref<8x256xf32, #tpu.memory_space<vmem>>, %arg2: memref<256x100xf32, #tpu.memory_space<vmem>>, %arg3: memref<1x100xf32, #tpu.memory_space<vmem>>, %arg4: memref<100x10xf32, #tpu.memory_space<vmem>>, %arg5: memref<1x10xf32, #tpu.memory_space<vmem>>, %arg6: memref<8x10xf32, #tpu.memory_space<vmem>>) attributes {dimension_semantics = [#tpu.dimension_semantics<parallel>], iteration_bounds = array<i64: 1>, scalar_prefetch = 0 : i64, scratch_operands = 0 : i64, tpu.core_type = #tpu.core_type<tc>, window_params = [{transform_indices = @transform_0, window_bounds = array<i64: 8, 256>}, {pipeline_mode = #tpu.pipeline_mode<synchronous>, transform_indices = @transform_1, window_bounds = array<i64: 256, 100>}, {pipeline_mode = #tpu.pipeline_mode<synchronous>, transform_indices = @transform_2, window_bounds = array<i64: 1, 100>}, {pipeline_mode = #tpu.pipeline_mode<synchronous>, transform_indices = @transform_3, window_bounds = array<i64: 100, 10>}, {pipeline_mode = #tpu.pipeline_mode<synchronous>, transform_indices = @transform_4, window_bounds = array<i64: 1, 10>}, {transform_indices = @transform_5, window_bounds = array<i64: 8, 10>}]} {
    %c0 = arith.constant 0 : index
    %c0_0 = arith.constant 0 : index
    %0 = vector.load %arg1[%c0, %c0_0] : memref<8x256xf32, #tpu.memory_space<vmem>>, vector<8x256xf32>
    %c0_1 = arith.constant 0 : index
    %c0_2 = arith.constant 0 : index
    %1 = vector.load %arg2[%c0_1, %c0_2] : memref<256x100xf32, #tpu.memory_space<vmem>>, vector<256x100xf32>
    %cst = arith.constant dense<0.000000e+00> : vector<8x100xf32>
    %2 = tpu.matmul %0, %1, %cst {dimension_numbers = #tpu.dot_dimension_numbers<[1], [0], [0], [1], [0, 0, 1, 1], [], []>} : vector<8x256xf32>, vector<256x100xf32>, vector<8x100xf32> -> vector<8x100xf32>
    %c0_3 = arith.constant 0 : index
    %c0_4 = arith.constant 0 : index
    %3 = vector.load %arg3[%c0_3, %c0_4] : memref<1x100xf32, #tpu.memory_space<vmem>>, vector<1x100xf32>
    %4 = vector.broadcast %3 : vector<1x100xf32> to vector<8x100xf32>
    %5 = arith.addf %2, %4 : vector<8x100xf32>
    %6 = math.tanh %5 : vector<8x100xf32>
    %c0_5 = arith.constant 0 : index
    %c0_6 = arith.constant 0 : index
    %7 = vector.load %arg4[%c0_5, %c0_6] : memref<100x10xf32, #tpu.memory_space<vmem>>, vector<100x10xf32>
    %cst_7 = arith.constant dense<0.000000e+00> : vector<8x10xf32>
    %8 = tpu.matmul %6, %7, %cst_7 {dimension_numbers = #tpu.dot_dimension_numbers<[1], [0], [0], [1], [0, 0, 1, 1], [], []>} : vector<8x100xf32>, vector<100x10xf32>, vector<8x10xf32> -> vector<8x10xf32>
    %c0_8 = arith.constant 0 : index
    %c0_9 = arith.constant 0 : index
    %9 = vector.load %arg5[%c0_8, %c0_9] : memref<1x10xf32, #tpu.memory_space<vmem>>, vector<1x10xf32>
    %10 = vector.broadcast %9 : vector<1x10xf32> to vector<8x10xf32>
    %11 = arith.addf %8, %10 : vector<8x10xf32>
    %c0_10 = arith.constant 0 : index
    %c0_11 = arith.constant 0 : index
    %12 = vector.load %arg6[%c0_10, %c0_11] : memref<8x10xf32, #tpu.memory_space<vmem>>, vector<8x10xf32>
    tpu.vector_store %arg6[%c0_10, %c0_11], %11 {strides = array<i32>} : memref<8x10xf32, #tpu.memory_space<vmem>>, vector<8x10xf32>,
    return
  }
  func.func @transform_0(%arg0: i32) -> (i32, i32) {
    %c0_i32 = arith.constant 0 : i32
    %c0_i32_0 = arith.constant 0 : i32
    return %arg0, %c0_i32 : i32, i32
  }
  func.func @transform_1(%arg0: i32) -> (i32, i32) {
    %c0_i32 = arith.constant 0 : i32
    %c0_i32_0 = arith.constant 0 : i32
    %c0_i32_1 = arith.constant 0 : i32
    return %c0_i32, %c0_i32_0 : i32, i32
  }
  func.func @transform_2(%arg0: i32) -> (i32, i32) {
    %c0_i32 = arith.constant 0 : i32
    %c0_i32_0 = arith.constant 0 : i32
    %c0_i32_1 = arith.constant 0 : i32
    return %c0_i32, %c0_i32_0 : i32, i32
  }
  func.func @transform_3(%arg0: i32) -> (i32, i32) {
    %c0_i32 = arith.constant 0 : i32
    %c0_i32_0 = arith.constant 0 : i32
    %c0_i32_1 = arith.constant 0 : i32
    return %c0_i32, %c0_i32_0 : i32, i32
  }
  func.func @transform_4(%arg0: i32) -> (i32, i32) {
    %c0_i32 = arith.constant 0 : i32
    %c0_i32_0 = arith.constant 0 : i32
    %c0_i32_1 = arith.constant 0 : i32
    return %c0_i32, %c0_i32_0 : i32, i32
  }
  func.func @transform_5(%arg0: i32) -> (i32, i32) {
    %c0_i32 = arith.constant 0 : i32
    %c0_i32_0 = arith.constant 0 : i32
    return %arg0, %c0_i32 : i32, i32
  }
}

</mosaic_0001>

<bundles_post_ra>
// kernel: tpu_custom_call.1
= control target key start
LH: loop header
LB: loop body
LE: loop exit
PB: predicated region body
PF: predicated region fallthrough
CT: control target
= control target key end

     0   :  { %v409_v7 = vmov 0.0|0.0   ;;  %s608_s0 = inlined_call_operand.vmem [shape: f32[8,256], index: 0, kind: input, shape index: {}]   ;;  %s609_s1 = inlined_call_operand.vmem [shape: f32[256,100], index: 1, kind: input, shape index: {}]   ;;  %s610_s2 = inlined_call_operand.vmem [shape: f32[1,100], index: 2, kind: input, shape index: {}]   ;;  %s611_s3 = inlined_call_operand.vmem [shape: f32[100,10], index: 3, kind: input, shape index: {}]   ;;  %s612_s4 = inlined_call_operand.vmem [shape: f32[1,10], index: 4, kind: input, shape index: {}]   ;;  %s613_s5 = inlined_call_operand.hbm [shape: f32[8,10], index: 5, kind: output, shape index: {}]  }
   0x1   :  { %v39_v0 = vld [vmem:[%s609_s1 + $0x80] sm:$0xff]  ;;  %v40_v1 = vld [vmem:[%s609_s1 + $0x88] sm:$0xff]  ;;  %v41_v5 = vld [vmem:[%s609_s1 + $0x90] sm:$0xff]  ;;  %361 = vmatprep.subr.bf16.mxu1 %v409_v7 }
   0x2   :  { %v23_v2 = vld [vmem:[%s609_s1] sm:$0xff]  ;;  %v329_v3 = vpack.c.bf16 %v40_v1, %v39_v0  ;;  %v24_v4 = vld [vmem:[%s609_s1 + $0x8] sm:$0xff]  ;;  %v42_v6 = vld [vmem:[%s609_s1 + $0x98] sm:$0xff] }
   0x3   :  { %v331_v8 = vpack.c.bf16 %v24_v4, %v23_v2  ;;  %v333_v9 = vpack.c.bf16 %v42_v6, %v41_v5  ;;  %v25_v10 = vld [vmem:[%s609_s1 + $0x10] sm:$0xff]  ;;  %v26_v11 = vld [vmem:[%s609_s1 + $0x18] sm:$0xff]  ;;  %v43_v12 = vld [vmem:[%s609_s1 + $0xa0] sm:$0xff] }
   0x4   :  { %330 = vmatprep.subr.bf16.mxu0 %v329_v3  ;;  %v44_v13 = vld [vmem:[%s609_s1 + $0xa8] sm:$0xff]  ;;  %v335_v14 = vpack.c.bf16 %v26_v11, %v25_v10  ;;  %v27_v16 = vld [vmem:[%s609_s1 + $0x20] sm:$0xff]  ;;  %v45_v18 = vld [vmem:[%s609_s1 + $0xb0] sm:$0xff] }
   0x5   :  { %332 = vmatpush3.bf16.msra.mxu0 %v331_v8  ;;  %v337_v15 = vpack.c.bf16 %v44_v13, %v43_v12  ;;  %v28_v17 = vld [vmem:[%s609_s1 + $0x28] sm:$0xff]  ;;  %v46_v19 = vld [vmem:[%s609_s1 + $0xb8] sm:$0xff]  ;;  %v29_v22 = vld [vmem:[%s609_s1 + $0x30] sm:$0xff] }
   0x6   :  { %334 = vmatprep.subr.bf16.mxu0 %v333_v9  ;;  %v339_v20 = vpack.c.bf16 %v28_v17, %v27_v16  ;;  %v341_v21 = vpack.c.bf16 %v46_v19, %v45_v18  ;;  %v30_v23 = vld [vmem:[%s609_s1 + $0x38] sm:$0xff]  ;;  %v47_v24 = vld [vmem:[%s609_s1 + $0xc0] sm:$0xff]  ;;  %v48_v25 = vld [vmem:[%s609_s1 + $0xc8] sm:$0xff] }
   0x7   :  { %v22_v26 = vld [vmem:[%s608_s0 + $0x8] sm:$0xff]  ;;  %v133_v27 = vld [vmem:[%s611_s3] sm:$0xff]  ;;  %v343_v29 = vpack.c.bf16 %v30_v23, %v29_v22  ;;  %v135_v31 = vld [vmem:[%s611_s3 + $0x10] sm:$0xff] }
   0x8   :  { %126 = vmatprep.mubr.f32.mxu0 %v22_v26  ;;  %v134_v28 = vld [vmem:[%s611_s3 + $0x8] sm:$0xff]  ;;  %v136_v32 = vld [vmem:[%s611_s3 + $0x18] sm:$0xff] }
   0x9   :  { %336 = vmatpush3.bf16.msra.mxu0 %v335_v14  ;;  %v362_v30 = vpack.c.bf16 %v134_v28, %v133_v27 }
   0xa   :  { %338 = vmatprep.subr.bf16.mxu0 %v337_v15 }
   0xd   :  { %340 = vmatpush3.bf16.msra.mxu0 %v339_v20 }
   0xe   :  { %10 = vsyncpa [#allocation3], 0  ;;  %342 = vmatprep.subr.bf16.mxu0 %v341_v21  ;;  %v345_v33 = vpack.c.bf16 %v48_v25, %v47_v24  ;;  %v31_v34 = vld [vmem:[%s609_s1 + $0x40] sm:$0xff]  ;;  %v32_v35 = vld [vmem:[%s609_s1 + $0x48] sm:$0xff]  ;;  %363 = vmatpush3.bf16.msra.mxu1 %v362_v30  ;;  %v365_v38 = vpack.c.bf16 %v136_v32, %v135_v31  ;;  %vm410_vm0 = vmmov 0   ;;  %v411_v5 = vmov 0.0  }
   0xf   :  { %v49_v36 = vld [vmem:[%s609_s1 + $0xd0] sm:$0xff]  ;;  %v50_v37 = vld [vmem:[%s609_s1 + $0xd8] sm:$0xff]  ;;  %364 = vmatprep.subr.bf16.mxu1 %v409_v7  ;;  %v347_v39 = vpack.c.bf16 %v32_v35, %v31_v34  ;;  %v51_v43 = vld [vmem:[%s609_s1 + $0xe0] sm:$0xff]  ;;  %326 = vmatprep.mubr.msk.f32.mxu1 %vm410_vm0, %v411_v5  ;;  %vm157_vm1 = vcmask 1043456   ;;  %vm153_vm2 = vcmask 818176   ;;  %s412_s14 = smov [#allocation2]  }
  0x10   :  { %v349_v40 = vpack.c.bf16 %v50_v37, %v49_v36  ;;  %v33_v41 = vld [vmem:[%s609_s1 + $0x50] sm:$0xff]  ;;  %v34_v42 = vld [vmem:[%s609_s1 + $0x58] sm:$0xff]  ;;  %v52_v44 = vld [vmem:[%s609_s1 + $0xe8] sm:$0xff]  ;;  %vm231_vm3 = vcmask 80896  }
  0x11   :  { %344 = vmatpush3.bf16.msra.mxu0 %v343_v29  ;;  %v351_v45 = vpack.c.bf16 %v34_v42, %v33_v41  ;;  %v353_v46 = vpack.c.bf16 %v52_v44, %v51_v43  ;;  %v35_v47 = vld [vmem:[%s609_s1 + $0x60] sm:$0xff]  ;;  %v36_v48 = vld [vmem:[%s609_s1 + $0x68] sm:$0xff]  ;;  %v53_v49 = vld [vmem:[%s609_s1 + $0xf0] sm:$0xff] }
  0x12   :  { %346 = vmatprep.subr.bf16.mxu0 %v345_v33  ;;  %366 = vmatpush3.bf16.msra.mxu1 %v365_v38  ;;  %v54_v50 = vld [vmem:[%s609_s1 + $0xf8] sm:$0xff]  ;;  %v355_v51 = vpack.c.bf16 %v36_v48, %v35_v47  ;;  %v37_v53 = vld [vmem:[%s609_s1 + $0x70] sm:$0xff]  ;;  %v21_v56 = vld [vmem:[%s608_s0] sm:$0xff] }
  0x13   :  { %367 = vmatprep.subr.bf16.mxu1 %v409_v7  ;;  %v357_v52 = vpack.c.bf16 %v54_v50, %v53_v49  ;;  %v38_v54 = vld [vmem:[%s609_s1 + $0x78] sm:$0xff]  ;;  %v137_v57 = vld [vmem:[%s611_s3 + $0x20] sm:$0xff]  ;;  %v138_v58 = vld [vmem:[%s611_s3 + $0x28] sm:$0xff] }
  0x14   :  { %v359_v55 = vpack.c.bf16 %v38_v54, %v37_v53  ;;  %v368_v59 = vpack.c.bf16 %v138_v58, %v137_v57  ;;  %v139_v60 = vld [vmem:[%s611_s3 + $0x30] sm:$0xff]  ;;  %v140_v61 = vld [vmem:[%s611_s3 + $0x38] sm:$0xff]  ;;  %v141_v63 = vld [vmem:[%s611_s3 + $0x40] sm:$0xff] }
  0x15   :  { %348 = vmatpush3.bf16.msra.mxu0 %v347_v39  ;;  %v371_v62 = vpack.c.bf16 %v140_v61, %v139_v60  ;;  %v142_v0 = vld [vmem:[%s611_s3 + $0x48] sm:$0xff]  ;;  %v143_v2 = vld [vmem:[%s611_s3 + $0x50] sm:$0xff]  ;;  %v144_v3 = vld [vmem:[%s611_s3 + $0x58] sm:$0xff] }
  0x16   :  { %350 = vmatprep.subr.bf16.mxu0 %v349_v40  ;;  %369 = vmatpush3.bf16.msra.mxu1 %v368_v59  ;;  %v374_v1 = vpack.c.bf16 %v142_v0, %v141_v63  ;;  %v377_v4 = vpack.c.bf16 %v144_v3, %v143_v2  ;;  %v145_v6 = vld [vmem:[%s611_s3 + $0x60] sm:$0xf]  ;;  %s239_s3 = sshll.u32 %s412_s14, 4  ;;  %s240_s3 = int_to_ptr.vmem [resolvable:$true] %s239_s3 }
  0x17   :  { %370 = vmatprep.subr.bf16.mxu1 %v409_v7  ;;  %v247_v9 = vld [vmem:[%s610_s2] ss:$0 sm:$0xff]  ;;  %s385_s2 = scalar_lea.vmem %s240_s3, 128  ;;  %p390_p1 = scmp.lt.s32.totalorder %s240_s3, %s240_s3 }
  0x18   :  { %p386_p0 = scmp.ne.s32.totalorder %s240_s3, %s385_s2  ;;  %p391_p2 = scmp.lt.s32.totalorder %s385_s2, %s385_s2 }
  0x19   :  { %352 = vmatpush3.bf16.msra.mxu0 %v351_v45 }
  0x1a   :  { %354 = vmatprep.subr.bf16.mxu0 %v353_v46  ;;  %372 = vmatpush3.bf16.msra.mxu1 %v371_v62  ;;  %p392_p3 = por %p391_p2, %p390_p1 }
  0x1b   :  { %373 = vmatprep.subr.bf16.mxu1 %v409_v7 }
  0x1c   :  { %p393_p4 = pnand %p392_p3, %p386_p0 }
  0x1d   :  { %356 = vmatpush3.bf16.msra.mxu0 %v355_v51 }
  0x1e   :  { %358 = vmatprep.subr.bf16.mxu0 %v357_v52  ;;  %375 = vmatpush3.bf16.msra.mxu1 %v374_v1 }
  0x1f   :  { %376 = vmatprep.subr.bf16.mxu1 %v409_v7  ;;  %v248_v7 = vld [vmem:[%s612_s4] ss:$0 sm:$0xff] }
  0x21   :  { %360 = vmatpush3.bf16.msra.mxu0 %v359_v55 }
  0x22   :  { %378 = vmatpush3.bf16.msra.mxu1 %v377_v4 }
  0x23   :  { %324 = vmatprep.subr.mxu1 %v411_v5 }
  0x24   :  { %127 = vmatmul.mubr.f32.vlgmr.msra.gmra.mrb[0].mxu0 %v21_v56 }
  0x26   :  { %325 = vmatpush3.msk.msra.mxu1 %vm157_vm1, %v145_v6 }
  0xf7   :  { %v283_v8 = vpop.f32.mrb[0].mxu0 }
  0xf8   :  { %v284_v10 = vpop.f32.mrb[1].mxu0 }
  0xf9   :  { %v285_v11 = vadd.f32 %v284_v10, %v283_v8 }
  0xfb   :  { %v129_v12 = vadd.f32 %v285_v11, %v247_v9 }
  0xfd   :  { %383 = vtanh.f32 %v129_v12 }
 0x107   :  { %v384_v13 = vpop.eup %383 }
 0x108   :  { %327 = vmatmul.mubr.msk.f32.vlgmr.msra.gmra.mrb[0].mxu1 %vm153_vm2, %v384_v13 }
 0x1db   :  { %v227_v14 = vpop.f32.mrb[0].mxu1 }
 0x1dc   :  { %v228_v15 = vadd.f32 %v248_v7, %v227_v14  ;;  %v328_v16 = vpop.f32.mrb[1].mxu1 }
 0x1de   :  { %232 = vst.msk [vmem:[#allocation2] sm:$0xff] %vm231_vm3, %v228_v15 }
 0x1df   :  { %396 = shalt.err (!%p393_p4)
}
 0x1e0   :  { %s397_s17 = scalar_lea.hbm %s613_s5, 128 }
 0x1e1   :  { %p398_p5 = scmp.ne.s32.totalorder %s613_s5, %s397_s17  ;;  %p401_p6 = scmp.lt.u32.totalorder %s397_s17, %s613_s5 }
 0x1e3   :  { %p403_p7 = pnand %p401_p6, %p398_p5 }
 0x1e5   :  { %406 = shalt.err (!%p403_p7)
}
 0x1e6   :  { %242 = dma.vmem_to_hbm [thread:$0]  %s240_s3, 128, %s613_s5, [#allocation3]  }
 0x1e7   :  { %407 = dma.done.wait [#allocation3], 128  }
 0x1e8   :  { %408 = vsyncadd [#allocation3], 4294967168 }
 0x1e9   :  { %246 = vsyncpa [#allocation3], 1 }

</bundles_post_ra>
